<compile_context>
chip_gen: v7x
topology: tpu7x:2x2x1
jax: 0.10.0
libtpu: 0.0.40
codegen_flags: <defaults>
</compile_context>

<pallas_src>
import jax
import jax.numpy as jnp
from jax.experimental import pallas as pl
from jax.experimental.pallas import tpu as pltpu


def _mlp_kernel(xt_ref, w1_ref, b1_ref, w3_ref, b3_ref, o_ref):
    # Feature-major x tile: (F_IN, TM); cast to f32 in-kernel.
    xt = xt_ref[...].astype(jnp.float32)
    w1 = w1_ref[...].astype(jnp.float32)      # (HID, F_IN) -- PyTorch layout
    b1 = b1_ref[...].astype(jnp.float32)      # (HID, 1)
    w3 = w3_ref[...].astype(jnp.float32)      # (OUT, HID)
    b3 = b3_ref[...].astype(jnp.float32)      # (OUT, 1)

    # hT = W1 @ xT -> (HID, TM): batch on the lane axis, plain NN matmul.
    h = jnp.dot(w1, xt, preferred_element_type=jnp.float32)
    h = jnp.maximum(h + b1, 0.0)                                   # Linear+ReLU

    # yT = W3 @ hT -> (OUT, TM): lane-dense output tile.
    z = jnp.dot(w3, h, preferred_element_type=jnp.float32) + b3    # Linear
    o_ref[...] = jax.nn.sigmoid(z)                                 # Sigmoid


def _pick_tile(n, tm_max):
    """Batch tile size on the lane axis (multiple of 128, or the full N)."""
    tm_max = max(128, (tm_max // 128) * 128)
    if n <= 128:
        return n                       # single full-extent block
    # Ensure >= 2 grid steps so v7x's two TensorCores both get a tile.
    half = -(-n // 2)
    half_aligned = -(-half // 128) * 128
    return min(tm_max, half_aligned)


def net_forward_t(x_t, w1, b1, w3, b3, *, tm_max=65536):
    """Transpose-free forward: x_t is (first, N); returns (out, N) float32."""
    f_in, n = x_t.shape
    hid = w1.shape[0]
    out_dim = w3.shape[0]

    # Biases as column vectors so they broadcast along the lane (batch) axis.
    b1c = b1.reshape(hid, 1)
    b3c = b3.reshape(out_dim, 1)

    tm = _pick_tile(n, tm_max)
    grid = (pl.cdiv(n, tm),)

    const = lambda shape: pl.BlockSpec(shape, lambda i: (0, 0))

    cost = pl.CostEstimate(
        flops=2 * n * (f_in * hid + hid * out_dim),
        transcendentals=n * out_dim,
        bytes_accessed=(n * f_in * x_t.dtype.itemsize + n * out_dim * 4
                        + (hid * f_in + hid + out_dim * hid + out_dim) * 4),
    )

    return pl.pallas_call(
        _mlp_kernel,
        out_shape=jax.ShapeDtypeStruct((out_dim, n), jnp.float32),
        grid=grid,
        in_specs=[
            pl.BlockSpec((f_in, tm), lambda i: (0, i)),   # x: lane-dense tiles
            const((hid, f_in)),                           # W1 (VMEM-resident)
            const((hid, 1)),                              # b1 (VMEM-resident)
            const((out_dim, hid)),                        # W3 (VMEM-resident)
            const((out_dim, 1)),                          # b3 (VMEM-resident)
        ],
        out_specs=pl.BlockSpec((out_dim, tm), lambda i: (0, i)),
        compiler_params=pltpu.CompilerParams(
            dimension_semantics=("parallel",),
            vmem_limit_bytes=32 * 1024 * 1024,
        ),
        cost_estimate=cost,
    )(x_t, w1, b1c, w3, b3c)


def net_forward(x, w1, b1, w3, b3, *, tm_max=65536):
    """Module-exact forward: x is (N, first); returns (N, out) float32.

    The kernel itself works in the lane-dense transposed layout; the two edge
    transposes live here so the module's interface is preserved. Callers that
    can produce/consume (first, N)/(out, N) should use `net_forward_t` to skip
    both extra HBM passes.
    """
    y_t = net_forward_t(x.T, w1, b1, w3, b3, tm_max=tm_max)
    return y_t.T


def init_params(key, first=10, hidden=16, out=7):
    """Deterministic synthetic params mirroring nn.Linear shapes."""
    k1, k2, k3, k4 = jax.random.split(key, 4)
    lim1 = 1.0 / jnp.sqrt(jnp.float32(first))
    lim3 = 1.0 / jnp.sqrt(jnp.float32(hidden))
    w1 = jax.random.uniform(k1, (hidden, first), jnp.float32, -lim1, lim1)
    b1 = jax.random.uniform(k2, (hidden,), jnp.float32, -lim1, lim1)
    w3 = jax.random.uniform(k3, (out, hidden), jnp.float32, -lim3, lim3)
    b3 = jax.random.uniform(k4, (out,), jnp.float32, -lim3, lim3)
    return w1, b1, w3, b3


def _ref_forward(x, w1, b1, w3, b3):
    xf = x.astype(jnp.float32)
    h = jnp.maximum(xf @ w1.T + b1, 0.0)
    return jax.nn.sigmoid(h @ w3.T + b3)


if __name__ == "__main__":
    key = jax.random.PRNGKey(0)
    kx, kp, kx2, kx3 = jax.random.split(key, 4)

    # T != 1  =>  first = 10; hidden = 16; out = 7.
    N, FIRST, HID, OUT = 8, 10, 16, 7
    w1, b1, w3, b3 = init_params(kp, first=FIRST, hidden=HID, out=OUT)

    # Small single-block case through the module-exact interface.
    x = jax.random.normal(kx, (N, FIRST), jnp.float32)
    y = net_forward(x, w1, b1, w3, b3)
    jax.block_until_ready(y)
    assert y.shape == (N, OUT)
    assert jnp.allclose(y, _ref_forward(x, w1, b1, w3, b3), atol=1e-5, rtol=1e-5)

    # Multi-tile case: batch grid with a partial last tile (300 = 2*128 + 44).
    N2 = 300
    x2 = jax.random.normal(kx2, (N2, FIRST), jnp.float32)
    y2 = net_forward(x2, w1, b1, w3, b3, tm_max=128)
    jax.block_until_ready(y2)
    assert y2.shape == (N2, OUT)
    assert jnp.allclose(y2, _ref_forward(x2, w1, b1, w3, b3), atol=1e-5, rtol=1e-5)

    # Default tile selection (>=2 grid steps for v7x) via the transpose-free
    # entry point.
    N3 = 1024
    x3 = jax.random.normal(kx3, (N3, FIRST), jnp.float32)
    y3_t = net_forward_t(x3.T, w1, b1, w3, b3)
    jax.block_until_ready(y3_t)
    assert y3_t.shape == (OUT, N3)
    assert jnp.allclose(y3_t.T, _ref_forward(x3, w1, b1, w3, b3),
                        atol=1e-5, rtol=1e-5)

    print("KERNEL_OK")
</pallas_src>

<mosaic_0001>
module attributes {stable_mosaic.version = 11 : i64} {
  func.func @_mlp_kernel(%arg0: i32, %arg1: memref<10x8xf32, #tpu.memory_space<vmem>>, %arg2: memref<16x10xf32, #tpu.memory_space<vmem>>, %arg3: memref<16x1xf32, #tpu.memory_space<vmem>>, %arg4: memref<7x16xf32, #tpu.memory_space<vmem>>, %arg5: memref<7x1xf32, #tpu.memory_space<vmem>>, %arg6: memref<7x8xf32, #tpu.memory_space<vmem>>) attributes {dimension_semantics = [#tpu.dimension_semantics<parallel>], iteration_bounds = array<i64: 1>, scalar_prefetch = 0 : i64, scratch_operands = 0 : i64, tpu.core_type = #tpu.core_type<tc>, window_params = [{transform_indices = @transform_0, window_bounds = array<i64: 10, 8>}, {pipeline_mode = #tpu.pipeline_mode<synchronous>, transform_indices = @transform_1, window_bounds = array<i64: 16, 10>}, {pipeline_mode = #tpu.pipeline_mode<synchronous>, transform_indices = @transform_2, window_bounds = array<i64: 16, 1>}, {pipeline_mode = #tpu.pipeline_mode<synchronous>, transform_indices = @transform_3, window_bounds = array<i64: 7, 16>}, {pipeline_mode = #tpu.pipeline_mode<synchronous>, transform_indices = @transform_4, window_bounds = array<i64: 7, 1>}, {transform_indices = @transform_5, window_bounds = array<i64: 7, 8>}]} {
    %c0 = arith.constant 0 : index
    %c0_0 = arith.constant 0 : index
    %0 = vector.load %arg1[%c0, %c0_0] : memref<10x8xf32, #tpu.memory_space<vmem>>, vector<10x8xf32>
    %c0_1 = arith.constant 0 : index
    %c0_2 = arith.constant 0 : index
    %1 = vector.load %arg2[%c0_1, %c0_2] : memref<16x10xf32, #tpu.memory_space<vmem>>, vector<16x10xf32>
    %c0_3 = arith.constant 0 : index
    %c0_4 = arith.constant 0 : index
    %2 = vector.load %arg3[%c0_3, %c0_4] : memref<16x1xf32, #tpu.memory_space<vmem>>, vector<16x1xf32>
    %c0_5 = arith.constant 0 : index
    %c0_6 = arith.constant 0 : index
    %3 = vector.load %arg4[%c0_5, %c0_6] : memref<7x16xf32, #tpu.memory_space<vmem>>, vector<7x16xf32>
    %c0_7 = arith.constant 0 : index
    %c0_8 = arith.constant 0 : index
    %4 = vector.load %arg5[%c0_7, %c0_8] : memref<7x1xf32, #tpu.memory_space<vmem>>, vector<7x1xf32>
    %cst = arith.constant dense<0.000000e+00> : vector<16x8xf32>
    %5 = tpu.matmul %1, %0, %cst {dimension_numbers = #tpu.dot_dimension_numbers<[1], [0], [0], [1], [0, 0, 1, 1], [], []>} : vector<16x10xf32>, vector<10x8xf32>, vector<16x8xf32> -> vector<16x8xf32>
    %6 = vector.broadcast %2 : vector<16x1xf32> to vector<16x8xf32>
    %7 = arith.addf %5, %6 : vector<16x8xf32>
    %cst_9 = arith.constant 0.000000e+00 : f32
    %8 = vector.broadcast %cst_9 : f32 to vector<16x8xf32>
    %9 = arith.maximumf %7, %8 : vector<16x8xf32>
    %cst_10 = arith.constant dense<0.000000e+00> : vector<7x8xf32>
    %10 = tpu.matmul %3, %9, %cst_10 {dimension_numbers = #tpu.dot_dimension_numbers<[1], [0], [0], [1], [0, 0, 1, 1], [], []>} : vector<7x16xf32>, vector<16x8xf32>, vector<7x8xf32> -> vector<7x8xf32>
    %11 = vector.broadcast %4 : vector<7x1xf32> to vector<7x8xf32>
    %12 = arith.addf %10, %11 : vector<7x8xf32>
    %13 = arith.negf %12 : vector<7x8xf32>
    %14 = math.exp %13 : vector<7x8xf32>
    %cst_11 = arith.constant 1.000000e+00 : f32
    %15 = vector.broadcast %cst_11 : f32 to vector<7x8xf32>
    %16 = arith.addf %15, %14 : vector<7x8xf32>
    %17 = arith.divf %15, %16 : vector<7x8xf32>
    %c0_12 = arith.constant 0 : index
    %c0_13 = arith.constant 0 : index
    %18 = vector.load %arg6[%c0_12, %c0_13] : memref<7x8xf32, #tpu.memory_space<vmem>>, vector<7x8xf32>
    tpu.vector_store %arg6[%c0_12, %c0_13], %17 {strides = array<i32>} : memref<7x8xf32, #tpu.memory_space<vmem>>, vector<7x8xf32>,
    return
  }
  func.func @transform_0(%arg0: i32) -> (i32, i32) {
    %c0_i32 = arith.constant 0 : i32
    %c0_i32_0 = arith.constant 0 : i32
    return %c0_i32, %arg0 : i32, i32
  }
  func.func @transform_1(%arg0: i32) -> (i32, i32) {
    %c0_i32 = arith.constant 0 : i32
    %c0_i32_0 = arith.constant 0 : i32
    %c0_i32_1 = arith.constant 0 : i32
    return %c0_i32, %c0_i32_0 : i32, i32
  }
  func.func @transform_2(%arg0: i32) -> (i32, i32) {
    %c0_i32 = arith.constant 0 : i32
    %c0_i32_0 = arith.constant 0 : i32
    %c0_i32_1 = arith.constant 0 : i32
    return %c0_i32, %c0_i32_0 : i32, i32
  }
  func.func @transform_3(%arg0: i32) -> (i32, i32) {
    %c0_i32 = arith.constant 0 : i32
    %c0_i32_0 = arith.constant 0 : i32
    %c0_i32_1 = arith.constant 0 : i32
    return %c0_i32, %c0_i32_0 : i32, i32
  }
  func.func @transform_4(%arg0: i32) -> (i32, i32) {
    %c0_i32 = arith.constant 0 : i32
    %c0_i32_0 = arith.constant 0 : i32
    %c0_i32_1 = arith.constant 0 : i32
    return %c0_i32, %c0_i32_0 : i32, i32
  }
  func.func @transform_5(%arg0: i32) -> (i32, i32) {
    %c0_i32 = arith.constant 0 : i32
    %c0_i32_0 = arith.constant 0 : i32
    return %c0_i32, %arg0 : i32, i32
  }
}

</mosaic_0001>

<bundles_post_ra>
// kernel: tpu_custom_call.1
= control target key start
LH: loop header
LB: loop body
LE: loop exit
PB: predicated region body
PF: predicated region fallthrough
CT: control target
= control target key end

     0   :  { %vm46_vm0 = vcmask 1041408   ;;  %vm299_vm1 = vmmov 1   ;;  %vm39_vm3 = vcmask 80896   ;;  %v300_v5 = vmov 0   ;;  %s371_s0 = inlined_call_operand.vmem [shape: f32[10,8], index: 0, kind: input, shape index: {}]   ;;  %s372_s1 = inlined_call_operand.vmem [shape: f32[16,10], index: 1, kind: input, shape index: {}]   ;;  %s373_s2 = inlined_call_operand.vmem [shape: f32[16,1], index: 2, kind: input, shape index: {}]   ;;  %s374_s3 = inlined_call_operand.vmem [shape: f32[7,16], index: 3, kind: input, shape index: {}]   ;;  %s375_s4 = inlined_call_operand.vmem [shape: f32[7,1], index: 4, kind: input, shape index: {}]   ;;  %s376_s5 = inlined_call_operand.hbm [shape: f32[7,8], index: 5, kind: output, shape index: {}]  }
   0x1   :  { %v21_v0 = vld [vmem:[%s371_s0] sm:$0xff]  ;;  %v22_v1 = vld [vmem:[%s371_s0 + $0x8] sm:$0x3]  ;;  %vm255_vm2 = vmpackc.low %vm46_vm0, %vm299_vm1  ;;  %269 = vset.pattern.permute.xlu0 %v300_v5 }
   0x2   :  { %v23_v2 = vld [vmem:[%s372_s1] sm:$0xff]  ;;  %v254_v3 = vpack.c.bf16 %v22_v1, %v21_v0 }
   0x3   :  { %v25_v4 = vld [vmem:[%s373_s2] sm:$0xff]  ;;  %244 = vmatprep.mubr.msk.f32.mxu0 %vm39_vm3, %v23_v2 }
   0x4   :  { %10 = vsyncpa [#allocation3], 0  ;;  %256 = vmatprep.subr.msk.bf16.mxu0 %vm255_vm2, %v254_v3  ;;  %31 = vperm.xlu0 %269, %v25_v4   ;;  %v24_v6 = vld [vmem:[%s372_s1 + $0x8] sm:$0xff]  ;;  %v301_v8 = vmov 0.0|0.0   ;;  %vm302_vm4 = vmmov 0   ;;  %v303_v9 = vmov 0.0  }
   0x5   :  { %259 = vmatpush3.bf16.msk.msra.mxu0 %vm255_vm2, %v254_v3  ;;  %v26_v7 = vld [vmem:[%s373_s2 + $0x8] sm:$0xff]  ;;  %270 = vset.pattern.permute.xlu1 %v300_v5  ;;  %v28_v10 = vld [vmem:[%s375_s4] sm:$0x7f]  ;;  %vm132_vm5 = vcmask 130048   ;;  %s304_s4 = smov [#allocation2]   ;;  %vm212_vm6 = vcmask 63488  }
   0x6   :  { %260 = vmatprep.subr.bf16.mxu1 %v301_v8  ;;  %251 = vmatprep.mubr.msk.f32.mxu1 %vm302_vm4, %v303_v9  ;;  %v27_v20 = vld [vmem:[%s374_s3] sm:$0x7f]  ;;  %s220_s6 = sshll.u32 %s304_s4, 4  ;;  %s221_s6 = int_to_ptr.vmem [resolvable:$true] %s220_s6 }
   0x7   :  { %129 = vperm.xlu1 %270, %v28_v10   ;;  %s275_s7 = scalar_lea.vmem %s221_s6, 128  ;;  %p280_p1 = scmp.lt.s32.totalorder %s221_s6, %s221_s6 }
   0x8   :  { %245 = vmatmul.mubr.msk.f32.vlgmr.msra.gmra.mrb[0].mxu0 %vm39_vm3, %v24_v6  ;;  %36 = vperm.xlu0 %269, %v26_v7   ;;  %p276_p0 = scmp.ne.s32.totalorder %s221_s6, %s275_s7  ;;  %p281_p2 = scmp.lt.s32.totalorder %s275_s7, %s275_s7 }
   0xa   :  { %p282_p3 = por %p281_p2, %p280_p1 }
   0xc   :  { %p283_p4 = pnand %p282_p3, %p276_p0 }
  0x83   :  { %v32_v11 = vpop.permute.xlu0 %31 }
  0x86   :  { %v130_v21 = vpop.permute.xlu1 %129 }
  0x87   :  { %v37_v12 = vpop.permute.xlu0 %36 }
  0xdb   :  { %v246_v13 = vpop.f32.mrb[0].mxu0 }
  0xdc   :  { %v122_v14 = vadd.f32 %v246_v13, %v37_v12  ;;  %v116_v15 = vpop.f32.mrb[1].mxu0 }
  0xdd   :  { %v117_v16 = vadd.f32 %v116_v15, %v32_v11 }
  0xde   :  { %v126_v17 = vmax.f32 %v122_v14, 0.0 }
  0xdf   :  { %v125_v18 = vmax.f32 %v117_v16, 0.0 }
  0xe1   :  { %v261_v19 = vpack.c.bf16 %v126_v17, %v125_v18 }
  0xe3   :  { %262 = vmatpush3.bf16.msra.mxu1 %v261_v19 }
  0xe6   :  { %252 = vmatmul.mubr.msk.f32.vlgmr.msra.gmra.mrb[0].mxu1 %vm132_vm5, %v27_v20 }
 0x1b9   :  { %v202_v22 = vpop.f32.mrb[0].mxu1 }
 0x1ba   :  { %v203_v23 = vadd.f32 %v202_v22, %v130_v21  ;;  %v253_v24 = vpop.f32.mrb[1].mxu1 }
 0x1bc   :  { %v232_v25 = vmul.f32 -1.442695, %v203_v23 }
 0x1be   :  { %271 = vpow2.f32 %v232_v25 }
 0x1c8   :  { %v272_v26 = vpop.eup %271 }
 0x1c9   :  { %v209_v27 = vadd.f32 1.0, %v272_v26 }
 0x1cb   :  { %273 = vrcp.f32 %v209_v27 }
 0x1d5   :  { %v274_v28 = vpop.eup %273 }
 0x1d6   :  { %213 = vst.msk [vmem:[#allocation2] sm:$0x7f] %vm212_vm6, %v274_v28 }
 0x1d7   :  { %286 = shalt.err (!%p283_p4)
}
 0x1d8   :  { %s287_s9 = scalar_lea.hbm %s376_s5, 128 }
 0x1d9   :  { %p288_p5 = scmp.ne.s32.totalorder %s376_s5, %s287_s9  ;;  %p291_p6 = scmp.lt.u32.totalorder %s287_s9, %s376_s5 }
 0x1db   :  { %p293_p7 = pnand %p291_p6, %p288_p5 }
 0x1dd   :  { %296 = shalt.err (!%p293_p7)
}
 0x1de   :  { %223 = dma.vmem_to_hbm [thread:$0]  %s221_s6, 128, %s376_s5, [#allocation3]  }
 0x1df   :  { %297 = dma.done.wait [#allocation3], 128  }
 0x1e0   :  { %298 = vsyncadd [#allocation3], 4294967168 }
 0x1e1   :  { %227 = vsyncpa [#allocation3], 1 }

</bundles_post_ra>
